<compile_context>
chip_gen: v6e
topology: v6e:2x2x1
jax: 0.10.0
libtpu: 0.0.40
codegen_flags: <defaults>
</compile_context>

<pallas_src>
import jax
import jax.numpy as jnp
from jax.experimental import pallas as pl
from jax.experimental.pallas import tpu as pltpu

_LANES = 128
_SUBLANES = 8


def _ceil_div(a, b):
    return -(-a // b)


def _double_bce_kernel(x_ref, y_ref, out_ref, acc_ref):
    i = pl.program_id(1)

    @pl.when(i == 0)
    def _():
        acc_ref[...] = jnp.zeros_like(acc_ref)

    x = x_ref[...].astype(jnp.float32)
    y = y_ref[...].astype(jnp.float32)
    # Numerically stable BCE-with-logits (matches torch.nn.BCEWithLogitsLoss):
    #   l = max(x, 0) - x*y + log1p(exp(-|x|))
    bce = jnp.maximum(x, 0.0) - x * y + jnp.log1p(jnp.exp(-jnp.abs(x)))
    # Fold sublane groups of 8 rows into the small (8, 128) accumulator.
    acc_ref[...] += jnp.sum(bce.reshape(-1, _SUBLANES, _LANES), axis=0)

    @pl.when(i == pl.num_programs(1) - 1)
    def _():
        # One cross-lane reduce per shard; full-block (unmasked) lane-dense store.
        out_ref[...] = jnp.full(out_ref.shape, jnp.sum(acc_ref[...]), jnp.float32)


def double_bce_loss(logits, smoothed_labels, *, tile_rows=2048, num_shards=2):
    """total_loss = mean_n( bce(x[:,0], y[:,0]) + bce(x[:,1], y[:,1]) )."""
    n, c = logits.shape
    assert smoothed_labels.shape == (n, c)

    total = n * c
    rows_needed = _ceil_div(total, _LANES)

    # Clamp per-step tile to the available work; keep the sublane dim a
    # multiple of 8 so blocks obey the (8, 128) layout constraint.
    tile_rows = max(_SUBLANES,
                    min(tile_rows, _ceil_div(rows_needed, _SUBLANES) * _SUBLANES))
    tile_rows = _ceil_div(tile_rows, _SUBLANES) * _SUBLANES

    tiles_total = _ceil_div(rows_needed, tile_rows)
    if tiles_total < num_shards:
        num_shards = 1
    inner_tiles = _ceil_div(tiles_total, num_shards)
    rows_padded = num_shards * inner_tiles * tile_rows
    padded_total = rows_padded * _LANES

    x_flat = logits.reshape(-1)                 # keep input dtype (bf16 ok)
    y_flat = smoothed_labels.reshape(-1)
    if padded_total > total:
        pad = padded_total - total
        # Zero-loss sentinel padding: logit -> -1e9 (softplus underflows to
        # exactly 0), label -> 0, so padded lanes contribute nothing.
        x_flat = jnp.pad(x_flat, (0, pad), constant_values=-1e9)
        y_flat = jnp.pad(y_flat, (0, pad), constant_values=0)
    x2d = x_flat.reshape(rows_padded, _LANES)
    y2d = y_flat.reshape(rows_padded, _LANES)

    # Double-buffered inputs + tiny (8,128) accumulator/output, with headroom;
    # stays well under v7x's 64 MiB and v5e's raised scoped-VMEM limits.
    elt_bytes = max(jnp.dtype(x2d.dtype).itemsize, jnp.dtype(y2d.dtype).itemsize)
    work_bytes = tile_rows * _LANES * (2 * 2 * elt_bytes) + 4 * _SUBLANES * _LANES * 4
    vmem_limit = int(min(48 * 1024 * 1024, max(3 * work_bytes, 4 * 1024 * 1024)))

    partial = pl.pallas_call(
        _double_bce_kernel,
        out_shape=jax.ShapeDtypeStruct((num_shards, _SUBLANES, _LANES), jnp.float32),
        grid_spec=pltpu.PrefetchScalarGridSpec(
            num_scalar_prefetch=0,
            grid=(num_shards, inner_tiles),
            in_specs=[
                pl.BlockSpec((tile_rows, _LANES),
                             lambda s, i: (s * inner_tiles + i, 0)),
                pl.BlockSpec((tile_rows, _LANES),
                             lambda s, i: (s * inner_tiles + i, 0)),
            ],
            out_specs=pl.BlockSpec((1, _SUBLANES, _LANES), lambda s, i: (s, 0, 0)),
            scratch_shapes=[pltpu.VMEM((_SUBLANES, _LANES), jnp.float32)],
        ),
        compiler_params=pltpu.CompilerParams(
            dimension_semantics=("parallel", "arbitrary"),
            vmem_limit_bytes=vmem_limit),
    )(x2d, y2d)

    # TODO(synk): the PyTorch module also computes (but never returns)
    # per-sample individual_losses; only the returned scalar is produced here.
    return jnp.sum(partial[:, 0, 0]) / n


def double_bce_ref(logits, smoothed_labels):
    x = logits.astype(jnp.float32)
    y = smoothed_labels.astype(jnp.float32)
    per = jnp.maximum(x, 0.0) - x * y + jnp.log1p(jnp.exp(-jnp.abs(x)))
    return jnp.mean(per[:, 0] + per[:, 1])


if __name__ == "__main__":
    key = jax.random.PRNGKey(0)
    k1, k2, k3, k4 = jax.random.split(key, 4)

    # Case 1: small (N, 2) input, default tiling (single shard, padding path).
    N1 = 200
    logits1 = jax.random.normal(k1, (N1, 2), dtype=jnp.float32)
    labels1 = jax.random.uniform(k2, (N1, 2), dtype=jnp.float32)
    out1 = double_bce_loss(logits1, labels1)
    jax.block_until_ready(out1)
    ref1 = double_bce_ref(logits1, labels1)
    assert jnp.allclose(out1, ref1, rtol=1e-4, atol=1e-5), (out1, ref1)

    # Case 2: forces the 2-shard / multi-inner-tile path (exercises the grid
    # index math and per-shard partial-sum outputs).
    N2 = 2000
    logits2 = jax.random.normal(k3, (N2, 2), dtype=jnp.float32)
    labels2 = jax.random.uniform(k4, (N2, 2), dtype=jnp.float32)
    out2 = double_bce_loss(logits2, labels2, tile_rows=8, num_shards=2)
    jax.block_until_ready(out2)
    ref2 = double_bce_ref(logits2, labels2)
    assert jnp.allclose(out2, ref2, rtol=1e-4, atol=1e-5), (out2, ref2)

    print("KERNEL_OK")
</pallas_src>

<mosaic_0001>
module attributes {stable_mosaic.version = 11 : i64} {
  func.func @_double_bce_kernel(%arg0: i32, %arg1: i32, %arg2: memref<8x128xf32, #tpu.memory_space<vmem>>, %arg3: memref<8x128xf32, #tpu.memory_space<vmem>>, %arg4: memref<1x8x128xf32, #tpu.memory_space<vmem>>, %arg5: memref<8x128xf32, #tpu.memory_space<vmem>>) attributes {dimension_semantics = [#tpu.dimension_semantics<parallel>, #tpu.dimension_semantics<arbitrary>], iteration_bounds = array<i64: 1, 1>, scalar_prefetch = 0 : i64, scratch_operands = 1 : i64, tpu.core_type = #tpu.core_type<tc>, window_params = [{transform_indices = @transform_0, window_bounds = array<i64: 8, 128>}, {transform_indices = @transform_1, window_bounds = array<i64: 8, 128>}, {transform_indices = @transform_2, window_bounds = array<i64: 1, 8, 128>}]} {
    %c0_i32 = arith.constant 0 : i32
    %0 = arith.cmpi eq, %arg1, %c0_i32 : i32
    %1 = arith.extui %0 : i1 to i32
    %c0_i32_0 = arith.constant 0 : i32
    %2 = arith.cmpi ne, %1, %c0_i32_0 : i32
    scf.if %2 {
      %cst_12 = arith.constant 0.000000e+00 : f32
      %23 = vector.broadcast %cst_12 : f32 to vector<8x128xf32>
      %c0_13 = arith.constant 0 : index
      %c0_14 = arith.constant 0 : index
      %24 = vector.load %arg5[%c0_13, %c0_14] : memref<8x128xf32, #tpu.memory_space<vmem>>, vector<8x128xf32>
      tpu.vector_store %arg5[%c0_13, %c0_14], %23 {strides = array<i32>} : memref<8x128xf32, #tpu.memory_space<vmem>>, vector<8x128xf32>,
    } else {
    }
    %c0 = arith.constant 0 : index
    %c0_1 = arith.constant 0 : index
    %3 = vector.load %arg2[%c0, %c0_1] : memref<8x128xf32, #tpu.memory_space<vmem>>, vector<8x128xf32>
    %c0_2 = arith.constant 0 : index
    %c0_3 = arith.constant 0 : index
    %4 = vector.load %arg3[%c0_2, %c0_3] : memref<8x128xf32, #tpu.memory_space<vmem>>, vector<8x128xf32>
    %cst = arith.constant 0.000000e+00 : f32
    %5 = vector.broadcast %cst : f32 to vector<8x128xf32>
    %6 = arith.maximumf %3, %5 : vector<8x128xf32>
    %7 = arith.mulf %3, %4 : vector<8x128xf32>
    %8 = arith.subf %6, %7 : vector<8x128xf32>
    %9 = math.absf %3 : vector<8x128xf32>
    %cst_4 = arith.constant 0.000000e+00 : f32
    %10 = vector.broadcast %cst_4 : f32 to vector<8x128xf32>
    %11 = arith.subf %10, %9 : vector<8x128xf32>
    %12 = math.exp %11 : vector<8x128xf32>
    %13 = math.log1p %12 : vector<8x128xf32>
    %14 = arith.addf %8, %13 : vector<8x128xf32>
    %c0_5 = arith.constant 0 : index
    %c0_6 = arith.constant 0 : index
    %15 = vector.load %arg5[%c0_5, %c0_6] : memref<8x128xf32, #tpu.memory_space<vmem>>, vector<8x128xf32>
    %16 = vector.shape_cast %14 : vector<8x128xf32> to vector<1x8x128xf32>
    %cst_7 = arith.constant dense<0.000000e+00> : vector<8x128xf32>
    %17 = vector.multi_reduction <add>, %16, %cst_7 [0] : vector<1x8x128xf32> to vector<8x128xf32>
    %18 = arith.addf %15, %17 : vector<8x128xf32>
    %c0_8 = arith.constant 0 : index
    %c0_9 = arith.constant 0 : index
    %19 = vector.load %arg5[%c0_8, %c0_9] : memref<8x128xf32, #tpu.memory_space<vmem>>, vector<8x128xf32>
    tpu.vector_store %arg5[%c0_8, %c0_9], %18 {strides = array<i32>} : memref<8x128xf32, #tpu.memory_space<vmem>>, vector<8x128xf32>,
    %c0_i32_10 = arith.constant 0 : i32
    %20 = arith.cmpi eq, %arg1, %c0_i32_10 : i32
    %21 = arith.extui %20 : i1 to i32
    %c0_i32_11 = arith.constant 0 : i32
    %22 = arith.cmpi ne, %21, %c0_i32_11 : i32
    scf.if %22 {
      %c0_12 = arith.constant 0 : index
      %c0_13 = arith.constant 0 : index
      %23 = vector.load %arg5[%c0_12, %c0_13] : memref<8x128xf32, #tpu.memory_space<vmem>>, vector<8x128xf32>
      %24 = vector.shape_cast %23 : vector<8x128xf32> to vector<1x8x128xf32>
      %cst_14 = arith.constant dense<0.000000e+00> : vector<1xf32>
      %25 = vector.multi_reduction <add>, %24, %cst_14 [1, 2] : vector<1x8x128xf32> to vector<1xf32>
      %26 = vector.shape_cast %25 : vector<1xf32> to vector<1x1x1xf32>
      %27 = vector.extract %26[0, 0, 0] : f32 from vector<1x1x1xf32>
      %28 = vector.broadcast %27 : f32 to vector<1x8x128xf32>
      %c0_15 = arith.constant 0 : index
      %c0_16 = arith.constant 0 : index
      %c0_17 = arith.constant 0 : index
      %29 = vector.load %arg4[%c0_15, %c0_16, %c0_17] : memref<1x8x128xf32, #tpu.memory_space<vmem>>, vector<1x8x128xf32>
      tpu.vector_store %arg4[%c0_15, %c0_16, %c0_17], %28 {strides = array<i32>} : memref<1x8x128xf32, #tpu.memory_space<vmem>>, vector<1x8x128xf32>,
    } else {
    }
    return
  }
  func.func @transform_0(%arg0: i32, %arg1: i32) -> (i32, i32) {
    %c1_i32 = arith.constant 1 : i32
    %0 = arith.muli %arg0, %c1_i32 : i32
    %1 = arith.addi %0, %arg1 : i32
    %c0_i32 = arith.constant 0 : i32
    %c0_i32_0 = arith.constant 0 : i32
    return %1, %c0_i32 : i32, i32
  }
  func.func @transform_1(%arg0: i32, %arg1: i32) -> (i32, i32) {
    %c1_i32 = arith.constant 1 : i32
    %0 = arith.muli %arg0, %c1_i32 : i32
    %1 = arith.addi %0, %arg1 : i32
    %c0_i32 = arith.constant 0 : i32
    %c0_i32_0 = arith.constant 0 : i32
    return %1, %c0_i32 : i32, i32
  }
  func.func @transform_2(%arg0: i32, %arg1: i32) -> (i32, i32, i32) {
    %c0_i32 = arith.constant 0 : i32
    %c0_i32_0 = arith.constant 0 : i32
    %c0_i32_1 = arith.constant 0 : i32
    return %arg0, %c0_i32, %c0_i32_0 : i32, i32, i32
  }
}

</mosaic_0001>

<bundles_post_ra>
// kernel: tpu_custom_call.1
= control target key start
LH: loop header
LB: loop body
LE: loop exit
PB: predicated region body
PF: predicated region fallthrough
CT: control target
= control target key end

     0   :  { %7 = vsyncpa [#allocation4], 0  ;;  %s205_s0 = inlined_call_operand.hbm [shape: f32[8,128], index: 0, kind: input, shape index: {}]   ;;  %s206_s1 = inlined_call_operand.hbm [shape: f32[8,128], index: 1, kind: input, shape index: {}]   ;;  %s207_s2 = inlined_call_operand.hbm [shape: f32[1,8,128], index: 2, kind: output, shape index: {}]  }
   0x1   :  { %8 = vsyncpa [#allocation7], 0 }
   0x2   :  { %9 = vsyncpa [#allocation5], 0  ;;  %s178_s9 = smov [#allocation3]   ;;  %s179_s11 = smov [#allocation6]  }
   0x3   :  { %s19_s10 = sshll.u32 %s178_s9, 4  ;;  %s32_s12 = sshll.u32 %s179_s11, 4  ;;  %s20_s10 = int_to_ptr.vmem [resolvable:$true] %s19_s10  ;;  %s33_s12 = int_to_ptr.vmem [resolvable:$true] %s32_s12 }
   0x4   :  { %s120_s13 = scalar_lea.vmem %s20_s10, 128  ;;  %p125_p1 = scmp.lt.s32.totalorder %s20_s10, %s20_s10 }
   0x5   :  { %p121_p0 = scmp.ne.s32.totalorder %s20_s10, %s120_s13  ;;  %p126_p2 = scmp.lt.s32.totalorder %s120_s13, %s120_s13 }
   0x7   :  { %p127_p3 = por %p126_p2, %p125_p1 }
   0x9   :  { %p128_p4 = pnand %p127_p3, %p121_p0 }
   0xb   :  { %131 = shalt.err (!%p128_p4)
}
   0xc   :  { %22 = dma.hbm_to_vmem [thread:$0]  %s205_s0, 128, %s20_s10, [#allocation4]  }
   0xd   :  { %s140_s16 = scalar_lea.vmem %s33_s12, 128  ;;  %p145_p6 = scmp.lt.s32.totalorder %s33_s12, %s33_s12 }
   0xe   :  { %p141_p5 = scmp.ne.s32.totalorder %s33_s12, %s140_s16  ;;  %p146_p7 = scmp.lt.s32.totalorder %s140_s16, %s140_s16 }
  0x10   :  { %p147_p8 = por %p146_p7, %p145_p6 }
  0x12   :  { %p148_p9 = pnand %p147_p8, %p141_p5 }
  0x14   :  { %151 = shalt.err (!%p148_p9)
}
  0x15   :  { %35 = dma.hbm_to_vmem [thread:$0]  %s206_s1, 128, %s33_s12, [#allocation7]  }
  0x16   :  { %172 = dma.done.wait [#allocation4], 128  }
  0x17   :  { %173 = vsyncadd [#allocation4], 4294967168 }
  0x18   :  { %174 = dma.done.wait [#allocation7], 128  }
  0x19   :  { %175 = vsyncadd [#allocation7], 4294967168  ;;  %v49_v0 = vld [vmem:[#allocation3] sm:$0xff]  ;;  %v50_v7 = vld [vmem:[#allocation6] sm:$0xff]  ;;  %s180_s0 = smov [#allocation8]  }
  0x1a   :  { %v54_v1 = vand.u32 2147483647, %v49_v0  ;;  %v51_v9 = vmax.f32 %v49_v0, 0.0  ;;  %v52_v10 = vmul.f32 %v50_v7, %v49_v0  ;;  %s93_s1 = sshll.u32 %s180_s0, 4  ;;  %s94_s1 = int_to_ptr.vmem [resolvable:$true] %s93_s1 }
  0x1b   :  { %s152_s20 = scalar_lea.vmem %s94_s1, 128  ;;  %p157_p11 = scmp.lt.s32.totalorder %s94_s1, %s94_s1 }
  0x1c   :  { %v55_v2 = vsub.f32 0.0, %v54_v1  ;;  %v53_v14 = vsub.f32 %v51_v9, %v52_v10  ;;  %p153_p10 = scmp.ne.s32.totalorder %s94_s1, %s152_s20  ;;  %p158_p12 = scmp.lt.s32.totalorder %s152_s20, %s152_s20 }
  0x1e   :  { %v56_v3 = vmul.f32 1.442695, %v55_v2  ;;  %p159_p13 = por %p158_p12, %p157_p11 }
  0x20   :  { %108 = vpow2.f32 %v56_v3  ;;  %p160_p0 = pnand %p159_p13, %p153_p10 }
  0x2d   :  { %v109_v4 = vpop.eup %108 }
  0x2e   :  { %v58_v5 = vadd.f32 1.0, %v109_v4  ;;  %v61_v6 = vmul.f32 -0.5, %v109_v4  ;;  %v64_v11 = vand.u32 2147483647, %v109_v4 }
  0x30   :  { %110 = vlog2.f32 %v58_v5  ;;  %v62_v8 = vadd.f32 1.0, %v61_v6  ;;  %vm65_vm0 = vcmp.lt.f32.partialorder %v64_v11, 0.0004427343 }
  0x32   :  { %v63_v12 = vmul.f32 %v109_v4, %v62_v8 }
  0x3d   :  { %v111_v13 = vpop.eup %110 }
  0x3e   :  { %v60_v15 = vmul.f32 0.6931472, %v111_v13 }
  0x40   :  { %v66_v16 = vsel %vm65_vm0, %v63_v12, %v60_v15 }
  0x41   :  { %v67_v17 = vadd.f32 %v66_v16, %v53_v14 }
  0x43   :  { %76 = vadd.xlane.f32.xlu0 %v67_v17 }
  0xcc   :  { %v77_v18 = vpop.xlane.xlu0 %76 }
  0xcd   :  { %v78_v19 = vrot.slane %v77_v18, 4 }
  0xcf   :  { %v79_v20 = vadd.f32 %v78_v19, %v77_v18 }
  0xd1   :  { %v80_v21 = vrot.slane %v79_v20, 2 }
  0xd3   :  { %v81_v22 = vadd.f32 %v80_v21, %v79_v20 }
  0xd5   :  { %v82_v23 = vrot.slane %v81_v22, 1 }
  0xd7   :  { %v83_v24 = vadd.f32 %v82_v23, %v81_v22 }
  0xd9   :  { %103 = vpush %v83_v24 }
 0x10a   :  { %s104_s19 = spop %103 }
 0x10b   :  { %v85_v25 = vstv %s104_s19 }
 0x10c   :  { %86 = vst [vmem:[#allocation8] sm:$0xff] %v85_v25 }
 0x10d   :  { %163 = shalt.err (!%p160_p0)
}
 0x10e   :  { %96 = dma.vmem_to_hbm [thread:$0]  %s94_s1, 128, %s207_s2, [#allocation5]  }
 0x10f   :  { %176 = dma.done.wait [#allocation5], 128  }
 0x110   :  { %177 = vsyncadd [#allocation5], 4294967168 }
 0x111   :  { %100 = vsyncpa [#allocation4], 1 }
 0x112   :  { %101 = vsyncpa [#allocation7], 1 }
 0x113   :  { %102 = vsyncpa [#allocation5], 1 }

</bundles_post_ra>
